<compile_context>
chip_gen: v7x
topology: tpu7x:2x2x1
jax: 0.10.0
libtpu: 0.0.40
codegen_flags: <defaults>
</compile_context>

<pallas_src>
import jax
import jax.numpy as jnp
import numpy as np
from jax.experimental import pallas as pl
from jax.experimental.pallas import tpu as pltpu


def _round_up(a, m):
    return (a + m - 1) // m * m


def _mlp_kernel(x_ref, w1_ref, b1_ref, w2_ref, b2_ref, ls_ref, tr_ref):
    # x_ref : (TM, D)    batch tile of the flattened input (compute dtype)
    # w1_ref: (D, H)     first Linear weight, (in, out) layout (VMEM-resident)
    # b1_ref: (1, H)     f32 bias
    # w2_ref: (H, 2D)    fused second Linear weight; [:, :D] = log_scale cols,
    #                    [:, D:] = translate cols (even/odd rows deinterleaved)
    # b2_ref: (1, 2D)    f32 fused bias
    d = ls_ref.shape[-1]
    h = jnp.dot(x_ref[...], w1_ref[...],
                preferred_element_type=jnp.float32) + b1_ref[...]
    h = jnp.maximum(h, 0.0).astype(w2_ref.dtype)          # ReLU
    out = jnp.dot(h, w2_ref[...],
                  preferred_element_type=jnp.float32) + b2_ref[...]
    out = out.astype(ls_ref.dtype)
    ls_ref[...] = out[:, :d]
    tr_ref[...] = out[:, d:]


def prepare_params(w1, b1, w2, b2, compute_dtype=jnp.float32):
    """One-time parameter preprocessing (hoist out of the per-call hot path).

    Args:
      w1: (hidden, input_size)   PyTorch Linear layout (out, in)
      b1: (hidden,)
      w2: (2*input_size, hidden) PyTorch Linear layout (out, in)
      b2: (2*input_size,)
    Returns:
      (w1_t, b1_r, w2_fused, b2_fused) ready for the Pallas kernel.
    """
    H, D = w1.shape
    w1_t = w1.T.astype(compute_dtype)                                 # (D, H)
    b1_r = b1.reshape(1, H).astype(jnp.float32)
    # Deinterleave the final layer's even/odd output rows and fuse both halves
    # into one matmul operand: columns [:D] -> log_scale, [D:] -> translate.
    w2_f = jnp.concatenate([w2[0::2, :].T, w2[1::2, :].T], axis=1)    # (H, 2D)
    w2_f = w2_f.astype(compute_dtype)
    b2_f = jnp.concatenate([b2[0::2], b2[1::2]]).reshape(1, 2 * D)
    b2_f = b2_f.astype(jnp.float32)
    return w1_t, b1_r, w2_f, b2_f


def scale_translate_densenet(x, params, input_shape):
    """Forward pass of ScaleTranslateDenseNet.

    Args:
      x: (B, *input_shape) float32
      params: output of prepare_params(...)
      input_shape: the module's input_shape (e.g. (C, H, W))
    Returns:
      (log_scale, translate), each (B, *input_shape), dtype of x.
    """
    w1_t, b1_r, w2_f, b2_f = params
    B = x.shape[0]
    D, H = w1_t.shape
    compute_dtype = w1_t.dtype

    x_flat = x.reshape(B, D).astype(compute_dtype)

    # Batch tile: pad B to the sublane granule so VPU work / stores run
    # full-width; cap the tile at 128 rows so large batches get a pipelined
    # (and, on v7x, megacore-sharded) grid while weights stay VMEM-resident.
    sub = 16 if compute_dtype == jnp.bfloat16 else 8
    tm = 128 if B >= 128 else int(_round_up(B, sub))
    b_pad = int(_round_up(B, tm))
    if b_pad != B:
        x_flat = jnp.pad(x_flat, ((0, b_pad - B), (0, 0)))
    grid_m = b_pad // tm

    itemsize = jnp.dtype(compute_dtype).itemsize
    flops = 2 * b_pad * D * H + 2 * b_pad * H * (2 * D)
    bytes_accessed = (b_pad * D * itemsize                 # x
                      + D * H * itemsize + H * 4           # w1, b1
                      + H * 2 * D * itemsize + 2 * D * 4   # fused w2, b2
                      + 2 * b_pad * D * x.dtype.itemsize)  # outputs

    ls, tr = pl.pallas_call(
        _mlp_kernel,
        out_shape=(jax.ShapeDtypeStruct((b_pad, D), x.dtype),
                   jax.ShapeDtypeStruct((b_pad, D), x.dtype)),
        grid_spec=pltpu.PrefetchScalarGridSpec(
            num_scalar_prefetch=0,
            grid=(grid_m,),
            in_specs=[
                pl.BlockSpec((tm, D), lambda i: (i, 0)),       # x batch tile
                pl.BlockSpec((D, H), lambda i: (0, 0)),        # w1 (resident)
                pl.BlockSpec((1, H), lambda i: (0, 0)),        # b1 (resident)
                pl.BlockSpec((H, 2 * D), lambda i: (0, 0)),    # fused w2
                pl.BlockSpec((1, 2 * D), lambda i: (0, 0)),    # fused b2
            ],
            out_specs=(pl.BlockSpec((tm, D), lambda i: (i, 0)),
                       pl.BlockSpec((tm, D), lambda i: (i, 0))),
        ),
        compiler_params=pltpu.CompilerParams(
            dimension_semantics=("parallel",)),
        cost_estimate=pl.CostEstimate(flops=flops, transcendentals=0,
                                      bytes_accessed=bytes_accessed),
    )(x_flat, w1_t, b1_r, w2_f, b2_f)

    log_scale = ls[:B].reshape(B, *input_shape)
    translate = tr[:B].reshape(B, *input_shape)
    return log_scale, translate


def _reference(x, w1, b1, w2, b2, input_shape):
    B = x.shape[0]
    out = jnp.maximum(x.reshape(B, -1) @ w1.T + b1, 0.0) @ w2.T + b2
    ls = out[:, 0::2].reshape(B, *input_shape)
    tr = out[:, 1::2].reshape(B, *input_shape)
    return ls, tr


if __name__ == "__main__":
    # Small shapes consistent with the module: batch=2, input_shape=(4,16,16),
    # hidden=32.
    input_shape = (4, 16, 16)
    B = 2
    hidden = 32
    D = int(np.prod(input_shape))

    key = jax.random.PRNGKey(0)
    kx, kw1, kb1, kw2, kb2 = jax.random.split(key, 5)

    x = jax.random.normal(kx, (B, *input_shape), dtype=jnp.float32)

    # Deterministic parameter init (uniform bounds mimic nn.Linear defaults).
    bound1 = 1.0 / np.sqrt(D)
    w1 = jax.random.uniform(kw1, (hidden, D), jnp.float32, -bound1, bound1)
    b1 = jax.random.uniform(kb1, (hidden,), jnp.float32, -bound1, bound1)
    bound2 = 1.0 / np.sqrt(hidden)
    w2 = jax.random.uniform(kw2, (2 * D, hidden), jnp.float32, -bound2, bound2)
    b2 = jax.random.uniform(kb2, (2 * D,), jnp.float32, -bound2, bound2)

    ls_ref, tr_ref = _reference(x, w1, b1, w2, b2, input_shape)

    # f32-operand path: matches PyTorch numerics to tight tolerance.
    params_f32 = prepare_params(w1, b1, w2, b2, compute_dtype=jnp.float32)
    log_scale, translate = scale_translate_densenet(x, params_f32, input_shape)
    jax.block_until_ready((log_scale, translate))
    np.testing.assert_allclose(np.asarray(log_scale), np.asarray(ls_ref),
                               rtol=1e-5, atol=1e-5)
    np.testing.assert_allclose(np.asarray(translate), np.asarray(tr_ref),
                               rtol=1e-5, atol=1e-5)

    # bf16-operand / f32-accumulation path (higher MXU throughput, halved
    # weight traffic); looser tolerance expected from the bf16 cast.
    params_bf16 = prepare_params(w1, b1, w2, b2, compute_dtype=jnp.bfloat16)
    ls_b, tr_b = scale_translate_densenet(x, params_bf16, input_shape)
    jax.block_until_ready((ls_b, tr_b))
    np.testing.assert_allclose(np.asarray(ls_b), np.asarray(ls_ref),
                               rtol=5e-2, atol=5e-2)
    np.testing.assert_allclose(np.asarray(tr_b), np.asarray(tr_ref),
                               rtol=5e-2, atol=5e-2)

    print("KERNEL_OK")
</pallas_src>

<mosaic_0001>
module attributes {stable_mosaic.version = 11 : i64} {
  func.func @_mlp_kernel(%arg0: i32, %arg1: memref<8x1024xf32, #tpu.memory_space<vmem>>, %arg2: memref<1024x32xf32, #tpu.memory_space<vmem>>, %arg3: memref<1x32xf32, #tpu.memory_space<vmem>>, %arg4: memref<32x2048xf32, #tpu.memory_space<vmem>>, %arg5: memref<1x2048xf32, #tpu.memory_space<vmem>>, %arg6: memref<8x1024xf32, #tpu.memory_space<vmem>>, %arg7: memref<8x1024xf32, #tpu.memory_space<vmem>>) attributes {dimension_semantics = [#tpu.dimension_semantics<parallel>], iteration_bounds = array<i64: 1>, scalar_prefetch = 0 : i64, scratch_operands = 0 : i64, tpu.core_type = #tpu.core_type<tc>, window_params = [{transform_indices = @transform_0, window_bounds = array<i64: 8, 1024>}, {pipeline_mode = #tpu.pipeline_mode<synchronous>, transform_indices = @transform_1, window_bounds = array<i64: 1024, 32>}, {pipeline_mode = #tpu.pipeline_mode<synchronous>, transform_indices = @transform_2, window_bounds = array<i64: 1, 32>}, {pipeline_mode = #tpu.pipeline_mode<synchronous>, transform_indices = @transform_3, window_bounds = array<i64: 32, 2048>}, {pipeline_mode = #tpu.pipeline_mode<synchronous>, transform_indices = @transform_4, window_bounds = array<i64: 1, 2048>}, {transform_indices = @transform_5, window_bounds = array<i64: 8, 1024>}, {transform_indices = @transform_6, window_bounds = array<i64: 8, 1024>}]} {
    %c0 = arith.constant 0 : index
    %c0_0 = arith.constant 0 : index
    %0 = vector.load %arg1[%c0, %c0_0] : memref<8x1024xf32, #tpu.memory_space<vmem>>, vector<8x1024xf32>
    %c0_1 = arith.constant 0 : index
    %c0_2 = arith.constant 0 : index
    %1 = vector.load %arg2[%c0_1, %c0_2] : memref<1024x32xf32, #tpu.memory_space<vmem>>, vector<1024x32xf32>
    %cst = arith.constant dense<0.000000e+00> : vector<8x32xf32>
    %2 = tpu.matmul %0, %1, %cst {dimension_numbers = #tpu.dot_dimension_numbers<[1], [0], [0], [1], [0, 0, 1, 1], [], []>} : vector<8x1024xf32>, vector<1024x32xf32>, vector<8x32xf32> -> vector<8x32xf32>
    %c0_3 = arith.constant 0 : index
    %c0_4 = arith.constant 0 : index
    %3 = vector.load %arg3[%c0_3, %c0_4] : memref<1x32xf32, #tpu.memory_space<vmem>>, vector<1x32xf32>
    %4 = vector.broadcast %3 : vector<1x32xf32> to vector<8x32xf32>
    %5 = arith.addf %2, %4 : vector<8x32xf32>
    %cst_5 = arith.constant 0.000000e+00 : f32
    %6 = vector.broadcast %cst_5 : f32 to vector<8x32xf32>
    %7 = arith.maximumf %5, %6 : vector<8x32xf32>
    %c0_6 = arith.constant 0 : index
    %c0_7 = arith.constant 0 : index
    %8 = vector.load %arg4[%c0_6, %c0_7] : memref<32x2048xf32, #tpu.memory_space<vmem>>, vector<32x2048xf32>
    %cst_8 = arith.constant dense<0.000000e+00> : vector<8x2048xf32>
    %9 = tpu.matmul %7, %8, %cst_8 {dimension_numbers = #tpu.dot_dimension_numbers<[1], [0], [0], [1], [0, 0, 1, 1], [], []>} : vector<8x32xf32>, vector<32x2048xf32>, vector<8x2048xf32> -> vector<8x2048xf32>
    %c0_9 = arith.constant 0 : index
    %c0_10 = arith.constant 0 : index
    %10 = vector.load %arg5[%c0_9, %c0_10] : memref<1x2048xf32, #tpu.memory_space<vmem>>, vector<1x2048xf32>
    %11 = vector.broadcast %10 : vector<1x2048xf32> to vector<8x2048xf32>
    %12 = arith.addf %9, %11 : vector<8x2048xf32>
    %13 = vector.extract_strided_slice %12 {offsets = [0, 0], sizes = [8, 1024], strides = [1, 1]} : vector<8x2048xf32> to vector<8x1024xf32>
    %c0_11 = arith.constant 0 : index
    %c0_12 = arith.constant 0 : index
    %14 = vector.load %arg6[%c0_11, %c0_12] : memref<8x1024xf32, #tpu.memory_space<vmem>>, vector<8x1024xf32>
    tpu.vector_store %arg6[%c0_11, %c0_12], %13 {strides = array<i32>} : memref<8x1024xf32, #tpu.memory_space<vmem>>, vector<8x1024xf32>,
    %15 = vector.extract_strided_slice %12 {offsets = [0, 1024], sizes = [8, 1024], strides = [1, 1]} : vector<8x2048xf32> to vector<8x1024xf32>
    %c0_13 = arith.constant 0 : index
    %c0_14 = arith.constant 0 : index
    %16 = vector.load %arg7[%c0_13, %c0_14] : memref<8x1024xf32, #tpu.memory_space<vmem>>, vector<8x1024xf32>
    tpu.vector_store %arg7[%c0_13, %c0_14], %15 {strides = array<i32>} : memref<8x1024xf32, #tpu.memory_space<vmem>>, vector<8x1024xf32>,
    return
  }
  func.func @transform_0(%arg0: i32) -> (i32, i32) {
    %c0_i32 = arith.constant 0 : i32
    %c0_i32_0 = arith.constant 0 : i32
    return %arg0, %c0_i32 : i32, i32
  }
  func.func @transform_1(%arg0: i32) -> (i32, i32) {
    %c0_i32 = arith.constant 0 : i32
    %c0_i32_0 = arith.constant 0 : i32
    %c0_i32_1 = arith.constant 0 : i32
    return %c0_i32, %c0_i32_0 : i32, i32
  }
  func.func @transform_2(%arg0: i32) -> (i32, i32) {
    %c0_i32 = arith.constant 0 : i32
    %c0_i32_0 = arith.constant 0 : i32
    %c0_i32_1 = arith.constant 0 : i32
    return %c0_i32, %c0_i32_0 : i32, i32
  }
  func.func @transform_3(%arg0: i32) -> (i32, i32) {
    %c0_i32 = arith.constant 0 : i32
    %c0_i32_0 = arith.constant 0 : i32
    %c0_i32_1 = arith.constant 0 : i32
    return %c0_i32, %c0_i32_0 : i32, i32
  }
  func.func @transform_4(%arg0: i32) -> (i32, i32) {
    %c0_i32 = arith.constant 0 : i32
    %c0_i32_0 = arith.constant 0 : i32
    %c0_i32_1 = arith.constant 0 : i32
    return %c0_i32, %c0_i32_0 : i32, i32
  }
  func.func @transform_5(%arg0: i32) -> (i32, i32) {
    %c0_i32 = arith.constant 0 : i32
    %c0_i32_0 = arith.constant 0 : i32
    return %arg0, %c0_i32 : i32, i32
  }
  func.func @transform_6(%arg0: i32) -> (i32, i32) {
    %c0_i32 = arith.constant 0 : i32
    %c0_i32_0 = arith.constant 0 : i32
    return %arg0, %c0_i32 : i32, i32
  }
}

</mosaic_0001>

<bundles_post_ra>
// kernel: tpu_custom_call.1
= control target key start
LH: loop header
LB: loop body
LE: loop exit
PB: predicated region body
PF: predicated region fallthrough
CT: control target
= control target key end

     0   :  { %12 = vsyncpa [#allocation3], 0  ;;  %s2311_s0 = inlined_call_operand.vmem [shape: f32[8,1024], index: 0, kind: input, shape index: {}]   ;;  %s2312_s1 = inlined_call_operand.vmem [shape: f32[1024,32], index: 1, kind: input, shape index: {}]   ;;  %s2313_s2 = inlined_call_operand.vmem [shape: f32[1,32], index: 2, kind: input, shape index: {}]   ;;  %s2314_s3 = inlined_call_operand.vmem [shape: f32[32,2048], index: 3, kind: input, shape index: {}]   ;;  %s2315_s4 = inlined_call_operand.vmem [shape: f32[1,2048], index: 4, kind: input, shape index: {}]   ;;  %s2316_s5 = inlined_call_operand.hbm [shape: f32[8,1024], index: 5, kind: output, shape index: {0}]   ;;  %s2317_s6 = inlined_call_operand.hbm [shape: f32[8,1024], index: 6, kind: output, shape index: {1}]  }
   0x1   :  { %v48_v0 = vld [vmem:[%s2312_s1 + $0x80] sm:$0xff]  ;;  %v49_v1 = vld [vmem:[%s2312_s1 + $0x88] sm:$0xff]  ;;  %v50_v11 = vld [vmem:[%s2312_s1 + $0x90] sm:$0xff] }
   0x2   :  { %v32_v2 = vld [vmem:[%s2312_s1] sm:$0xff]  ;;  %v1361_v3 = vpack.c.bf16 %v49_v1, %v48_v0  ;;  %v33_v4 = vld [vmem:[%s2312_s1 + $0x8] sm:$0xff]  ;;  %v51_v13 = vld [vmem:[%s2312_s1 + $0x98] sm:$0xff] }
   0x3   :  { %v80_v5 = vld [vmem:[%s2312_s1 + $0x180] sm:$0xff]  ;;  %v81_v6 = vld [vmem:[%s2312_s1 + $0x188] sm:$0xff]  ;;  %v1363_v7 = vpack.c.bf16 %v33_v4, %v32_v2  ;;  %v34_v14 = vld [vmem:[%s2312_s1 + $0x10] sm:$0xff]  ;;  %v1365_v16 = vpack.c.bf16 %v51_v13, %v50_v11 }
   0x4   :  { %v1393_v8 = vpack.c.bf16 %v81_v6, %v80_v5  ;;  %v64_v9 = vld [vmem:[%s2312_s1 + $0x100] sm:$0xff]  ;;  %v65_v10 = vld [vmem:[%s2312_s1 + $0x108] sm:$0xff]  ;;  %1362 = vmatprep.subr.bf16.mxu0 %v1361_v3  ;;  %v35_v15 = vld [vmem:[%s2312_s1 + $0x18] sm:$0xff] }
   0x5   :  { %v1395_v12 = vpack.c.bf16 %v65_v10, %v64_v9  ;;  %1364 = vmatpush3.bf16.msra.mxu0 %v1363_v7  ;;  %v1367_v17 = vpack.c.bf16 %v35_v15, %v34_v14  ;;  %v82_v18 = vld [vmem:[%s2312_s1 + $0x190] sm:$0xff]  ;;  %v83_v19 = vld [vmem:[%s2312_s1 + $0x198] sm:$0xff]  ;;  %v52_v23 = vld [vmem:[%s2312_s1 + $0xa0] sm:$0xff] }
   0x6   :  { %1394 = vmatprep.subr.bf16.mxu1 %v1393_v8  ;;  %v66_v20 = vld [vmem:[%s2312_s1 + $0x110] sm:$0xff]  ;;  %v1397_v21 = vpack.c.bf16 %v83_v19, %v82_v18  ;;  %v67_v22 = vld [vmem:[%s2312_s1 + $0x118] sm:$0xff]  ;;  %v53_v24 = vld [vmem:[%s2312_s1 + $0xa8] sm:$0xff]  ;;  %1366 = vmatprep.subr.bf16.mxu0 %v1365_v16 }
   0x7   :  { %1396 = vmatpush3.bf16.msra.mxu1 %v1395_v12  ;;  %v1399_v25 = vpack.c.bf16 %v67_v22, %v66_v20  ;;  %v1369_v26 = vpack.c.bf16 %v53_v24, %v52_v23  ;;  %v36_v27 = vld [vmem:[%s2312_s1 + $0x20] sm:$0xff]  ;;  %v37_v28 = vld [vmem:[%s2312_s1 + $0x28] sm:$0xff]  ;;  %v54_v35 = vld [vmem:[%s2312_s1 + $0xb0] sm:$0xff] }
   0x8   :  { %v84_v29 = vld [vmem:[%s2312_s1 + $0x1a0] sm:$0xff]  ;;  %1398 = vmatprep.subr.bf16.mxu1 %v1397_v21  ;;  %v85_v30 = vld [vmem:[%s2312_s1 + $0x1a8] sm:$0xff]  ;;  %v1371_v33 = vpack.c.bf16 %v37_v28, %v36_v27  ;;  %v55_v36 = vld [vmem:[%s2312_s1 + $0xb8] sm:$0xff] }
   0x9   :  { %v68_v31 = vld [vmem:[%s2312_s1 + $0x120] sm:$0xff]  ;;  %v69_v32 = vld [vmem:[%s2312_s1 + $0x128] sm:$0xff]  ;;  %1368 = vmatpush3.bf16.msra.mxu0 %v1367_v17  ;;  %v1401_v34 = vpack.c.bf16 %v85_v30, %v84_v29  ;;  %v38_v37 = vld [vmem:[%s2312_s1 + $0x30] sm:$0xff]  ;;  %v1373_v39 = vpack.c.bf16 %v55_v36, %v54_v35 }
   0xa   :  { %1370 = vmatprep.subr.bf16.mxu0 %v1369_v26  ;;  %v1403_v38 = vpack.c.bf16 %v69_v32, %v68_v31  ;;  %v39_v40 = vld [vmem:[%s2312_s1 + $0x38] sm:$0xff]  ;;  %v86_v41 = vld [vmem:[%s2312_s1 + $0x1b0] sm:$0xff]  ;;  %v56_v46 = vld [vmem:[%s2312_s1 + $0xc0] sm:$0xff] }
   0xb   :  { %1400 = vmatpush3.bf16.msra.mxu1 %v1399_v25  ;;  %v87_v42 = vld [vmem:[%s2312_s1 + $0x1b8] sm:$0xff]  ;;  %v70_v44 = vld [vmem:[%s2312_s1 + $0x130] sm:$0xff]  ;;  %v57_v47 = vld [vmem:[%s2312_s1 + $0xc8] sm:$0xff]  ;;  %v1375_v48 = vpack.c.bf16 %v39_v40, %v38_v37 }
   0xc   :  { %1402 = vmatprep.subr.bf16.mxu1 %v1401_v34  ;;  %v1405_v43 = vpack.c.bf16 %v87_v42, %v86_v41  ;;  %v71_v45 = vld [vmem:[%s2312_s1 + $0x138] sm:$0xff]  ;;  %v88_v49 = vld [vmem:[%s2312_s1 + $0x1c0] sm:$0xff]  ;;  %v89_v50 = vld [vmem:[%s2312_s1 + $0x1c8] sm:$0xff]  ;;  %v1377_v52 = vpack.c.bf16 %v57_v47, %v56_v46 }
   0xd   :  { %1372 = vmatpush3.bf16.msra.mxu0 %v1371_v33  ;;  %v1407_v51 = vpack.c.bf16 %v71_v45, %v70_v44  ;;  %v40_v53 = vld [vmem:[%s2312_s1 + $0x40] sm:$0xff]  ;;  %v41_v54 = vld [vmem:[%s2312_s1 + $0x48] sm:$0xff]  ;;  %v1409_v56 = vpack.c.bf16 %v89_v50, %v88_v49  ;;  %v58_v58 = vld [vmem:[%s2312_s1 + $0xd0] sm:$0xff] }
   0xe   :  { %1374 = vmatprep.subr.bf16.mxu0 %v1373_v39  ;;  %v72_v55 = vld [vmem:[%s2312_s1 + $0x140] sm:$0xff]  ;;  %v73_v57 = vld [vmem:[%s2312_s1 + $0x148] sm:$0xff]  ;;  %v59_v59 = vld [vmem:[%s2312_s1 + $0xd8] sm:$0xff]  ;;  %v1379_v62 = vpack.c.bf16 %v41_v54, %v40_v53 }
   0xf   :  { %1404 = vmatpush3.bf16.msra.mxu1 %v1403_v38  ;;  %v90_v60 = vld [vmem:[%s2312_s1 + $0x1d0] sm:$0xff]  ;;  %v91_v61 = vld [vmem:[%s2312_s1 + $0x1d8] sm:$0xff]  ;;  %v1411_v63 = vpack.c.bf16 %v73_v57, %v72_v55  ;;  %v1381_v0 = vpack.c.bf16 %v59_v59, %v58_v58  ;;  %v60_v6 = vld [vmem:[%s2312_s1 + $0xe0] sm:$0xff] }
  0x10   :  { %1406 = vmatprep.subr.bf16.mxu1 %v1405_v43  ;;  %v42_v1 = vld [vmem:[%s2312_s1 + $0x50] sm:$0xff]  ;;  %v43_v2 = vld [vmem:[%s2312_s1 + $0x58] sm:$0xff]  ;;  %v1413_v4 = vpack.c.bf16 %v91_v61, %v90_v60  ;;  %v61_v7 = vld [vmem:[%s2312_s1 + $0xe8] sm:$0xff] }
  0x11   :  { %1376 = vmatpush3.bf16.msra.mxu0 %v1375_v48  ;;  %v74_v3 = vld [vmem:[%s2312_s1 + $0x150] sm:$0xff]  ;;  %v75_v5 = vld [vmem:[%s2312_s1 + $0x158] sm:$0xff]  ;;  %v92_v8 = vld [vmem:[%s2312_s1 + $0x1e0] sm:$0xff]  ;;  %v1383_v10 = vpack.c.bf16 %v43_v2, %v42_v1  ;;  %v1385_v14 = vpack.c.bf16 %v61_v7, %v60_v6 }
  0x12   :  { %1378 = vmatprep.subr.bf16.mxu0 %v1377_v52  ;;  %v93_v9 = vld [vmem:[%s2312_s1 + $0x1e8] sm:$0xff]  ;;  %v44_v11 = vld [vmem:[%s2312_s1 + $0x60] sm:$0xff]  ;;  %v1415_v13 = vpack.c.bf16 %v75_v5, %v74_v3  ;;  %v62_v19 = vld [vmem:[%s2312_s1 + $0xf0] sm:$0xff] }
  0x13   :  { %1408 = vmatpush3.bf16.msra.mxu1 %v1407_v51  ;;  %v45_v12 = vld [vmem:[%s2312_s1 + $0x68] sm:$0xff]  ;;  %v76_v15 = vld [vmem:[%s2312_s1 + $0x160] sm:$0xff]  ;;  %v1417_v18 = vpack.c.bf16 %v93_v9, %v92_v8  ;;  %v63_v20 = vld [vmem:[%s2312_s1 + $0xf8] sm:$0xff] }
  0x14   :  { %1410 = vmatprep.subr.bf16.mxu1 %v1409_v56  ;;  %v77_v16 = vld [vmem:[%s2312_s1 + $0x168] sm:$0xff]  ;;  %v27_v21 = vld [vmem:[%s2311_s0 + $0x18] sm:$0xff]  ;;  %v94_v22 = vld [vmem:[%s2312_s1 + $0x1f0] sm:$0xff]  ;;  %v1387_v24 = vpack.c.bf16 %v45_v12, %v44_v11  ;;  %v1389_v26 = vpack.c.bf16 %v63_v20, %v62_v19 }
  0x15   :  { %1380 = vmatpush3.bf16.msra.mxu0 %v1379_v62  ;;  %v25_v17 = vld [vmem:[%s2311_s0 + $0x8] sm:$0xff]  ;;  %v95_v23 = vld [vmem:[%s2312_s1 + $0x1f8] sm:$0xff]  ;;  %301 = vmatprep.mubr.f32.mxu1 %v27_v21  ;;  %v1419_v25 = vpack.c.bf16 %v77_v16, %v76_v15  ;;  %v46_v27 = vld [vmem:[%s2312_s1 + $0x70] sm:$0xff] }
  0x16   :  { %1382 = vmatprep.subr.bf16.mxu0 %v1381_v0  ;;  %231 = vmatprep.mubr.f32.mxu0 %v25_v17  ;;  %v47_v28 = vld [vmem:[%s2312_s1 + $0x78] sm:$0xff]  ;;  %v78_v29 = vld [vmem:[%s2312_s1 + $0x170] sm:$0xff]  ;;  %v1421_v30 = vpack.c.bf16 %v95_v23, %v94_v22  ;;  %v112_v32 = vld [vmem:[%s2312_s1 + $0x280] sm:$0xff] }
  0x17   :  { %1412 = vmatpush3.bf16.msra.mxu1 %v1411_v63  ;;  %v79_v31 = vld [vmem:[%s2312_s1 + $0x178] sm:$0xff]  ;;  %v113_v33 = vld [vmem:[%s2312_s1 + $0x288] sm:$0xff]  ;;  %v144_v34 = vld [vmem:[%s2312_s1 + $0x380] sm:$0xff]  ;;  %v1391_v36 = vpack.c.bf16 %v47_v28, %v46_v27 }
  0x18   :  { %1414 = vmatprep.subr.bf16.mxu1 %v1413_v4  ;;  %v145_v35 = vld [vmem:[%s2312_s1 + $0x388] sm:$0xff]  ;;  %v1423_v37 = vpack.c.bf16 %v79_v31, %v78_v29  ;;  %v1425_v38 = vpack.c.bf16 %v113_v33, %v112_v32  ;;  %v96_v39 = vld [vmem:[%s2312_s1 + $0x200] sm:$0xff]  ;;  %v114_v44 = vld [vmem:[%s2312_s1 + $0x290] sm:$0xff] }
  0x19   :  { %1384 = vmatpush3.bf16.msra.mxu0 %v1383_v10  ;;  %v97_v40 = vld [vmem:[%s2312_s1 + $0x208] sm:$0xff]  ;;  %v128_v41 = vld [vmem:[%s2312_s1 + $0x300] sm:$0xff]  ;;  %v1457_v42 = vpack.c.bf16 %v145_v35, %v144_v34  ;;  %v115_v45 = vld [vmem:[%s2312_s1 + $0x298] sm:$0xff] }
  0x1a   :  { %1386 = vmatprep.subr.bf16.mxu0 %v1385_v14  ;;  %v129_v43 = vld [vmem:[%s2312_s1 + $0x308] sm:$0xff]  ;;  %v146_v46 = vld [vmem:[%s2312_s1 + $0x390] sm:$0xff]  ;;  %v147_v47 = vld [vmem:[%s2312_s1 + $0x398] sm:$0xff]  ;;  %v1427_v49 = vpack.c.bf16 %v97_v40, %v96_v39  ;;  %v1429_v52 = vpack.c.bf16 %v115_v45, %v114_v44 }
  0x1b   :  { %1416 = vmatpush3.bf16.msra.mxu1 %v1415_v13  ;;  %v24_v48 = vld [vmem:[%s2311_s0] sm:$0xff]  ;;  %v26_v50 = vld [vmem:[%s2311_s0 + $0x10] sm:$0xff]  ;;  %v1459_v51 = vpack.c.bf16 %v129_v43, %v128_v41  ;;  %v99_v54 = vld [vmem:[%s2312_s1 + $0x218] sm:$0xff]  ;;  %v1461_v56 = vpack.c.bf16 %v147_v47, %v146_v46 }
  0x1c   :  { %1418 = vmatprep.subr.bf16.mxu1 %v1417_v18  ;;  %v98_v53 = vld [vmem:[%s2312_s1 + $0x210] sm:$0xff]  ;;  %v131_v57 = vld [vmem:[%s2312_s1 + $0x318] sm:$0xff]  ;;  %v116_v58 = vld [vmem:[%s2312_s1 + $0x2a0] sm:$0xff] }
  0x1d   :  { %1388 = vmatpush3.bf16.msra.mxu0 %v1387_v24  ;;  %v130_v55 = vld [vmem:[%s2312_s1 + $0x310] sm:$0xff]  ;;  %v117_v59 = vld [vmem:[%s2312_s1 + $0x2a8] sm:$0xff]  ;;  %v148_v60 = vld [vmem:[%s2312_s1 + $0x3a0] sm:$0xff]  ;;  %v1431_v62 = vpack.c.bf16 %v99_v54, %v98_v53 }
  0x1e   :  { %1390 = vmatprep.subr.bf16.mxu0 %v1389_v26  ;;  %v149_v61 = vld [vmem:[%s2312_s1 + $0x3a8] sm:$0xff]  ;;  %v1463_v63 = vpack.c.bf16 %v131_v57, %v130_v55  ;;  %v1433_v0 = vpack.c.bf16 %v117_v59, %v116_v58  ;;  %v100_v1 = vld [vmem:[%s2312_s1 + $0x220] sm:$0xff]  ;;  %v118_v6 = vld [vmem:[%s2312_s1 + $0x2b0] sm:$0xff] }
  0x1f   :  { %1420 = vmatpush3.bf16.msra.mxu1 %v1419_v25  ;;  %v101_v2 = vld [vmem:[%s2312_s1 + $0x228] sm:$0xff]  ;;  %v132_v3 = vld [vmem:[%s2312_s1 + $0x320] sm:$0xff]  ;;  %v1465_v4 = vpack.c.bf16 %v149_v61, %v148_v60  ;;  %v119_v7 = vld [vmem:[%s2312_s1 + $0x2b8] sm:$0xff] }
  0x20   :  { %1422 = vmatprep.subr.bf16.mxu1 %v1421_v30  ;;  %v133_v5 = vld [vmem:[%s2312_s1 + $0x328] sm:$0xff]  ;;  %v150_v8 = vld [vmem:[%s2312_s1 + $0x3b0] sm:$0xff]  ;;  %v151_v9 = vld [vmem:[%s2312_s1 + $0x3b8] sm:$0xff]  ;;  %v1435_v10 = vpack.c.bf16 %v101_v2, %v100_v1  ;;  %v1437_v12 = vpack.c.bf16 %v119_v7, %v118_v6 }
  0x21   :  { %1392 = vmatpush3.bf16.msra.mxu0 %v1391_v36  ;;  %v1467_v11 = vpack.c.bf16 %v133_v5, %v132_v3  ;;  %v102_v13 = vld [vmem:[%s2312_s1 + $0x230] sm:$0xff]  ;;  %v103_v14 = vld [vmem:[%s2312_s1 + $0x238] sm:$0xff]  ;;  %v1469_v16 = vpack.c.bf16 %v151_v9, %v150_v8  ;;  %v120_v18 = vld [vmem:[%s2312_s1 + $0x2c0] sm:$0xff] }
  0x22   :  { %1426 = vmatprep.subr.bf16.mxu0 %v1425_v38  ;;  %v134_v15 = vld [vmem:[%s2312_s1 + $0x330] sm:$0xff]  ;;  %v135_v17 = vld [vmem:[%s2312_s1 + $0x338] sm:$0xff]  ;;  %v121_v19 = vld [vmem:[%s2312_s1 + $0x2c8] sm:$0xff]  ;;  %v1439_v22 = vpack.c.bf16 %v103_v14, %v102_v13 }
  0x23   :  { %1424 = vmatpush3.bf16.msra.mxu1 %v1423_v37  ;;  %v152_v20 = vld [vmem:[%s2312_s1 + $0x3c0] sm:$0xff]  ;;  %v153_v21 = vld [vmem:[%s2312_s1 + $0x3c8] sm:$0xff]  ;;  %v31_v25 = vld [vmem:[%s2311_s0 + $0x38] sm:$0xff]  ;;  %v1471_v26 = vpack.c.bf16 %v135_v17, %v134_v15  ;;  %v1441_v27 = vpack.c.bf16 %v121_v19, %v120_v18 }
  0x24   :  { %1458 = vmatprep.subr.bf16.mxu1 %v1457_v42  ;;  %232 = vmatmul.mubr.f32.vlgmr.msra.gmra.mrb[0].mxu0 %v24_v48  ;;  %v104_v23 = vld [vmem:[%s2312_s1 + $0x240] sm:$0xff]  ;;  %v29_v24 = vld [vmem:[%s2311_s0 + $0x28] sm:$0xff] }
  0x25   :  { %1428 = vmatpush3.bf16.msra.mxu0 %v1427_v49  ;;  %v105_v28 = vld [vmem:[%s2312_s1 + $0x248] sm:$0xff]  ;;  %v136_v29 = vld [vmem:[%s2312_s1 + $0x340] sm:$0xff] }
  0x26   :  { %302 = vmatmul.mubr.f32.vlgmr.msra.gmra.mrb[0].mxu1 %v26_v50  ;;  %1430 = vmatprep.subr.bf16.mxu0 %v1429_v52 }
  0x27   :  { %1460 = vmatpush3.bf16.msra.mxu1 %v1459_v51 }
  0x28   :  { %1462 = vmatprep.subr.bf16.mxu1 %v1461_v56 }
  0x29   :  { %1432 = vmatpush3.bf16.msra.mxu0 %v1431_v62 }
  0x2a   :  { %1434 = vmatprep.subr.bf16.mxu0 %v1433_v0 }
  0x2b   :  { %1464 = vmatpush3.bf16.msra.mxu1 %v1463_v63 }
  0x2c   :  { %1466 = vmatprep.subr.bf16.mxu1 %v1465_v4 }
  0x2d   :  { %1436 = vmatpush3.bf16.msra.mxu0 %v1435_v10 }
  0x2e   :  { %1438 = vmatprep.subr.bf16.mxu0 %v1437_v12 }
  0x2f   :  { %1468 = vmatpush3.bf16.msra.mxu1 %v1467_v11 }
  0x30   :  { %13 = vsyncpa [#allocation5], 0  ;;  %1470 = vmatprep.subr.bf16.mxu1 %v1469_v16  ;;  %v1473_v30 = vpack.c.bf16 %v153_v21, %v152_v20  ;;  %v137_v31 = vld [vmem:[%s2312_s1 + $0x348] sm:$0xff]  ;;  %v122_v32 = vld [vmem:[%s2312_s1 + $0x2d0] sm:$0xff]  ;;  %371 = vmatprep.mubr.f32.mxu0 %v29_v24  ;;  %v1443_v36 = vpack.c.bf16 %v105_v28, %v104_v23  ;;  %vm596_vm0 = vcmask 261120   ;;  %s1605_s26 = smov [#allocation2]  }
  0x31   :  { %v123_v33 = vld [vmem:[%s2312_s1 + $0x2d8] sm:$0xff]  ;;  %v154_v34 = vld [vmem:[%s2312_s1 + $0x3d0] sm:$0xff]  ;;  %441 = vmatprep.mubr.f32.mxu1 %v31_v25  ;;  %1440 = vmatpush3.bf16.msra.mxu0 %v1439_v22  ;;  %v1475_v37 = vpack.c.bf16 %v137_v31, %v136_v29  ;;  %v124_v44 = vld [vmem:[%s2312_s1 + $0x2e0] sm:$0xff]  ;;  %s1190_s27 = sshll.u32 %s1605_s26, 4  ;;  %s1191_s27 = int_to_ptr.vmem [resolvable:$true] %s1190_s27 }
  0x32   :  { %v155_v35 = vld [vmem:[%s2312_s1 + $0x3d8] sm:$0xff]  ;;  %1442 = vmatprep.subr.bf16.mxu0 %v1441_v27  ;;  %v1445_v38 = vpack.c.bf16 %v123_v33, %v122_v32  ;;  %v106_v39 = vld [vmem:[%s2312_s1 + $0x250] sm:$0xff]  ;;  %v125_v45 = vld [vmem:[%s2312_s1 + $0x2e8] sm:$0xff]  ;;  %p1561_p1 = scmp.lt.s32.totalorder %s1191_s27, %s1191_s27 }
  0x33   :  { %1472 = vmatpush3.bf16.msra.mxu1 %v1471_v26  ;;  %v107_v40 = vld [vmem:[%s2312_s1 + $0x258] sm:$0xff]  ;;  %v138_v41 = vld [vmem:[%s2312_s1 + $0x350] sm:$0xff]  ;;  %v1477_v42 = vpack.c.bf16 %v155_v35, %v154_v34  ;;  %v156_v46 = vld [vmem:[%s2312_s1 + $0x3e0] sm:$0xff]  ;;  %v1449_v50 = vpack.c.bf16 %v125_v45, %v124_v44 }
  0x34   :  { %1474 = vmatprep.subr.bf16.mxu1 %v1473_v30  ;;  %v139_v43 = vld [vmem:[%s2312_s1 + $0x358] sm:$0xff]  ;;  %v157_v47 = vld [vmem:[%s2312_s1 + $0x3e8] sm:$0xff]  ;;  %v1447_v48 = vpack.c.bf16 %v107_v40, %v106_v39  ;;  %v108_v51 = vld [vmem:[%s2312_s1 + $0x260] sm:$0xff] }
  0x35   :  { %1444 = vmatpush3.bf16.msra.mxu0 %v1443_v36  ;;  %v1479_v49 = vpack.c.bf16 %v139_v43, %v138_v41  ;;  %v109_v52 = vld [vmem:[%s2312_s1 + $0x268] sm:$0xff]  ;;  %v140_v53 = vld [vmem:[%s2312_s1 + $0x360] sm:$0xff]  ;;  %v1481_v54 = vpack.c.bf16 %v157_v47, %v156_v46  ;;  %v126_v56 = vld [vmem:[%s2312_s1 + $0x2f0] sm:$0xff] }
  0x36   :  { %1446 = vmatprep.subr.bf16.mxu0 %v1445_v38  ;;  %v141_v55 = vld [vmem:[%s2312_s1 + $0x368] sm:$0xff]  ;;  %v127_v57 = vld [vmem:[%s2312_s1 + $0x2f8] sm:$0xff]  ;;  %v158_v58 = vld [vmem:[%s2312_s1 + $0x3f0] sm:$0xff]  ;;  %v1451_v60 = vpack.c.bf16 %v109_v52, %v108_v51  ;;  %v1604_v38 = vmov 0.0  }
  0x37   :  { %1476 = vmatpush3.bf16.msra.mxu1 %v1475_v37  ;;  %v159_v59 = vld [vmem:[%s2312_s1 + $0x3f8] sm:$0xff]  ;;  %v1483_v61 = vpack.c.bf16 %v141_v55, %v140_v53  ;;  %v1453_v62 = vpack.c.bf16 %v127_v57, %v126_v56  ;;  %v110_v63 = vld [vmem:[%s2312_s1 + $0x270] sm:$0xff]  ;;  %v28_v6 = vld [vmem:[%s2311_s0 + $0x20] sm:$0xff] }
  0x38   :  { %1478 = vmatprep.subr.bf16.mxu1 %v1477_v42  ;;  %v111_v0 = vld [vmem:[%s2312_s1 + $0x278] sm:$0xff]  ;;  %v1485_v1 = vpack.c.bf16 %v159_v59, %v158_v58  ;;  %v142_v2 = vld [vmem:[%s2312_s1 + $0x370] sm:$0xff]  ;;  %v449_v8 = vld [vmem:[%s2314_s3 + $0x8] sm:$0xff] }
  0x39   :  { %1448 = vmatpush3.bf16.msra.mxu0 %v1447_v48  ;;  %v143_v3 = vld [vmem:[%s2312_s1 + $0x378] sm:$0xff]  ;;  %v1455_v4 = vpack.c.bf16 %v111_v0, %v110_v63  ;;  %v30_v7 = vld [vmem:[%s2311_s0 + $0x30] sm:$0xff]  ;;  %v465_v9 = vld [vmem:[%s2314_s3 + $0x88] sm:$0xff]  ;;  %s1556_s1 = scalar_lea.vmem %s1191_s27, 1024 }
  0x3a   :  { %1450 = vmatprep.subr.bf16.mxu0 %v1449_v50  ;;  %v1487_v5 = vpack.c.bf16 %v143_v3, %v142_v2  ;;  %v451_v10 = vld [vmem:[%s2314_s3 + $0x18] sm:$0xff]  ;;  %v1489_v11 = vpack.c.bf16 %v465_v9, %v449_v8  ;;  %v448_v13 = vld [vmem:[%s2314_s3] sm:$0xff]  ;;  %v450_v17 = vld [vmem:[%s2314_s3 + $0x10] sm:$0xff]  ;;  %p1557_p0 = scmp.ne.s32.totalorder %s1191_s27, %s1556_s1  ;;  %p1562_p2 = scmp.lt.s32.totalorder %s1556_s1, %s1556_s1 }
  0x3b   :  { %1480 = vmatpush3.bf16.msra.mxu1 %v1479_v49  ;;  %v467_v12 = vld [vmem:[%s2314_s3 + $0x98] sm:$0xff]  ;;  %v464_v14 = vld [vmem:[%s2314_s3 + $0x80] sm:$0xff]  ;;  %v466_v18 = vld [vmem:[%s2314_s3 + $0x90] sm:$0xff] }
  0x3c   :  { %1482 = vmatprep.subr.bf16.mxu1 %v1481_v54  ;;  %v1497_v15 = vpack.c.bf16 %v467_v12, %v451_v10  ;;  %v1491_v16 = vpack.c.bf16 %v464_v14, %v448_v13  ;;  %v1499_v19 = vpack.c.bf16 %v466_v18, %v450_v17  ;;  %v481_v20 = vld [vmem:[%s2314_s3 + $0x108] sm:$0xff]  ;;  %v483_v22 = vld [vmem:[%s2314_s3 + $0x118] sm:$0xff]  ;;  %v480_v25 = vld [vmem:[%s2314_s3 + $0x100] sm:$0xff]  ;;  %p1563_p3 = por %p1562_p2, %p1561_p1 }
  0x3d   :  { %1452 = vmatpush3.bf16.msra.mxu0 %v1451_v60  ;;  %v497_v21 = vld [vmem:[%s2314_s3 + $0x188] sm:$0xff]  ;;  %v499_v24 = vld [vmem:[%s2314_s3 + $0x198] sm:$0xff]  ;;  %v496_v26 = vld [vmem:[%s2314_s3 + $0x180] sm:$0xff] }
  0x3e   :  { %1454 = vmatprep.subr.bf16.mxu0 %v1453_v62  ;;  %v1493_v23 = vpack.c.bf16 %v497_v21, %v481_v20  ;;  %v1501_v27 = vpack.c.bf16 %v499_v24, %v483_v22  ;;  %v1495_v28 = vpack.c.bf16 %v496_v26, %v480_v25  ;;  %v482_v29 = vld [vmem:[%s2314_s3 + $0x110] sm:$0xff]  ;;  %v453_v32 = vld [vmem:[%s2314_s3 + $0x28] sm:$0xff]  ;;  %v455_v34 = vld [vmem:[%s2314_s3 + $0x38] sm:$0xff]  ;;  %p1564_p4 = pnand %p1563_p3, %p1557_p0 }
  0x3f   :  { %1484 = vmatpush3.bf16.msra.mxu1 %v1483_v61  ;;  %v498_v30 = vld [vmem:[%s2314_s3 + $0x190] sm:$0xff]  ;;  %v469_v33 = vld [vmem:[%s2314_s3 + $0xa8] sm:$0xff]  ;;  %v471_v36 = vld [vmem:[%s2314_s3 + $0xb8] sm:$0xff] }
  0x40   :  { %1486 = vmatprep.subr.bf16.mxu1 %v1485_v1  ;;  %v1503_v31 = vpack.c.bf16 %v498_v30, %v482_v29  ;;  %v1505_v35 = vpack.c.bf16 %v469_v33, %v453_v32  ;;  %v1513_v37 = vpack.c.bf16 %v471_v36, %v455_v34  ;;  %v1212_v40 = vld [vmem:[%s2313_s2] ss:$0 sm:$0xff]  ;;  %v454_v57 = vld [vmem:[%s2314_s3 + $0x30] sm:$0xff]  ;;  %v485_v59 = vld [vmem:[%s2314_s3 + $0x128] sm:$0xff] }
  0x41   :  { %1456 = vmatpush3.bf16.msra.mxu0 %v1455_v4  ;;  %v452_v54 = vld [vmem:[%s2314_s3 + $0x20] sm:$0xff]  ;;  %v470_v58 = vld [vmem:[%s2314_s3 + $0xb0] sm:$0xff]  ;;  %v501_v60 = vld [vmem:[%s2314_s3 + $0x1a8] sm:$0xff] }
  0x42   :  { %1490 = vmatprep.subr.bf16.mxu0 %v1489_v11  ;;  %v468_v55 = vld [vmem:[%s2314_s3 + $0xa0] sm:$0xff]  ;;  %v487_v61 = vld [vmem:[%s2314_s3 + $0x138] sm:$0xff]  ;;  %v1515_v1 = vpack.c.bf16 %v470_v58, %v454_v57  ;;  %v502_v8 = vld [vmem:[%s2314_s3 + $0x1b0] sm:$0xff] }
  0x43   :  { %1488 = vmatpush3.bf16.msra.mxu1 %v1487_v5  ;;  %v503_v62 = vld [vmem:[%s2314_s3 + $0x1b8] sm:$0xff]  ;;  %v1507_v0 = vpack.c.bf16 %v468_v55, %v452_v54  ;;  %v484_v2 = vld [vmem:[%s2314_s3 + $0x120] sm:$0xff]  ;;  %v1509_v5 = vpack.c.bf16 %v501_v60, %v485_v59  ;;  %v457_v9 = vld [vmem:[%s2314_s3 + $0x48] sm:$0xff]  ;;  %v516_v60 = vlaneseq }
  0x44   :  { %372 = vmatmul.mubr.f32.vlgmr.msra.gmra.mrb[2].mxu0 %v28_v6  ;;  %1498 = vmatprep.subr.bf16.mxu1 %v1497_v15  ;;  %v500_v3 = vld [vmem:[%s2314_s3 + $0x1a0] sm:$0xff]  ;;  %v1517_v6 = vpack.c.bf16 %v503_v62, %v487_v61  ;;  %v473_v10 = vld [vmem:[%s2314_s3 + $0xc8] sm:$0xff]  ;;  %v459_v11 = vld [vmem:[%s2314_s3 + $0x58] sm:$0xff] }
  0x45   :  { %1492 = vmatpush1.bf16.msra.mxu0 %v1491_v16  ;;  %664 = vmatprep.mubr.f32.mxu0 %v1604_v38  ;;  %v475_v12 = vld [vmem:[%s2314_s3 + $0xd8] sm:$0xff]  ;;  %v1511_v13 = vpack.c.bf16 %v500_v3, %v484_v2  ;;  %v456_v15 = vld [vmem:[%s2314_s3 + $0x40] sm:$0xff]  ;;  %v1521_v17 = vpack.c.bf16 %v473_v10, %v457_v9  ;;  %v474_v20 = vld [vmem:[%s2314_s3 + $0xd0] sm:$0xff]  ;;  %v2271_v61 = vshrl.u32 %v516_v60, 7 }
  0x46   :  { %442 = vmatmul.mubr.f32.vlgmr.msra.gmra.mrb[2].mxu1 %v30_v7  ;;  %1494 = vmatprep.subr.bf16.mxu0 %v1493_v23  ;;  %v486_v7 = vld [vmem:[%s2314_s3 + $0x130] sm:$0xff]  ;;  %v472_v16 = vld [vmem:[%s2314_s3 + $0xc0] sm:$0xff]  ;;  %v1529_v18 = vpack.c.bf16 %v475_v12, %v459_v11  ;;  %v489_v21 = vld [vmem:[%s2314_s3 + $0x148] sm:$0xff] }
  0x47   :  { %1500 = vmatpush1.bf16.msra.mxu1 %v1499_v19  ;;  %735 = vmatprep.mubr.f32.mxu1 %v1604_v38  ;;  %v1519_v14 = vpack.c.bf16 %v502_v8, %v486_v7  ;;  %v458_v19 = vld [vmem:[%s2314_s3 + $0x50] sm:$0xff]  ;;  %v505_v22 = vld [vmem:[%s2314_s3 + $0x1c8] sm:$0xff]  ;;  %v491_v23 = vld [vmem:[%s2314_s3 + $0x158] sm:$0xff]  ;;  %v1523_v25 = vpack.c.bf16 %v472_v16, %v456_v15  ;;  %v518_v62 = vsub.s32 0, %v2271_v61  ;;  %v534_v12 = vsub.s32 4, %v2271_v61 }
  0x48   :  { %1502 = vmatprep.subr.bf16.mxu1 %v1501_v27  ;;  %v507_v24 = vld [vmem:[%s2314_s3 + $0x1d8] sm:$0xff]  ;;  %v1531_v26 = vpack.c.bf16 %v474_v20, %v458_v19  ;;  %v488_v27 = vld [vmem:[%s2314_s3 + $0x140] sm:$0xff]  ;;  %v1525_v29 = vpack.c.bf16 %v505_v22, %v489_v21  ;;  %v506_v32 = vld [vmem:[%s2314_s3 + $0x1d0] sm:$0xff]  ;;  %v538_v16 = vsub.s32 5, %v2271_v61 }
  0x49   :  { %1496 = vmatpush1.bf16.msra.mxu0 %v1495_v28  ;;  %v504_v28 = vld [vmem:[%s2314_s3 + $0x1c0] sm:$0xff]  ;;  %v1533_v30 = vpack.c.bf16 %v507_v24, %v491_v23  ;;  %v461_v33 = vld [vmem:[%s2314_s3 + $0x68] sm:$0xff]  ;;  %v479_v36 = vld [vmem:[%s2314_s3 + $0xf8] sm:$0xff] }
  0x4a   :  { %1506 = vmatprep.subr.bf16.mxu0 %v1505_v35  ;;  %v477_v34 = vld [vmem:[%s2314_s3 + $0xe8] sm:$0xff]  ;;  %v463_v35 = vld [vmem:[%s2314_s3 + $0x78] sm:$0xff]  ;;  %v508_v55 = vld [vmem:[%s2314_s3 + $0x1e0] sm:$0xff] }
  0x4b   :  { %1504 = vmatpush1.bf16.msra.mxu1 %v1503_v31  ;;  %v490_v31 = vld [vmem:[%s2314_s3 + $0x150] sm:$0xff] }
  0x4c   :  { %1514 = vmatprep.subr.bf16.mxu1 %v1513_v37  ;;  %v1527_v37 = vpack.c.bf16 %v504_v28, %v488_v27  ;;  %v510_v57 = vld [vmem:[%s2314_s3 + $0x1f0] sm:$0xff] }
  0xf7   :  { %v1253_v39 = vpop.f32.mrb[0].mxu0 }
  0xf8   :  { %v1254_v41 = vpop.f32.mrb[1].mxu0 }
  0xf9   :  { %v1288_v42 = vpop.f32.mrb[0].mxu1  ;;  %v1255_v43 = vadd.f32 %v1254_v41, %v1253_v39  ;;  %v1535_v39 = vpack.c.bf16 %v506_v32, %v490_v31  ;;  %v476_v41 = vld [vmem:[%s2314_s3 + $0xe0] sm:$0xff] }
  0xfa   :  { %v1289_v44 = vpop.f32.mrb[1].mxu1 }
  0xfb   :  { %v1290_v45 = vadd.f32 %v1289_v44, %v1288_v42  ;;  %v234_v46 = vadd.f32 %v1255_v43, %v1212_v40  ;;  %v460_v40 = vld [vmem:[%s2314_s3 + $0x60] sm:$0xff]  ;;  %v1537_v42 = vpack.c.bf16 %v477_v34, %v461_v33  ;;  %v1545_v43 = vpack.c.bf16 %v479_v36, %v463_v35  ;;  %v462_v44 = vld [vmem:[%s2314_s3 + $0x70] sm:$0xff] }
  0xfd   :  { %v304_v47 = vadd.f32 %v1290_v45, %v234_v46  ;;  %v478_v45 = vld [vmem:[%s2314_s3 + $0xf0] sm:$0xff]  ;;  %v493_v46 = vld [vmem:[%s2314_s3 + $0x168] sm:$0xff] }
 0x117   :  { %v1323_v48 = vpop.f32.mrb[2].mxu0 }
 0x118   :  { %v1324_v49 = vpop.f32.mrb[3].mxu0 }
 0x119   :  { %v1358_v50 = vpop.f32.mrb[2].mxu1  ;;  %v1325_v51 = vadd.f32 %v1324_v49, %v1323_v48  ;;  %v495_v48 = vld [vmem:[%s2314_s3 + $0x178] sm:$0xff] }
 0x11a   :  { %v1359_v52 = vpop.f32.mrb[3].mxu1  ;;  %v511_v49 = vld [vmem:[%s2314_s3 + $0x1f8] sm:$0xff] }
 0x11b   :  { %v1360_v53 = vadd.f32 %v1359_v52, %v1358_v50  ;;  %v374_v56 = vadd.f32 %v1325_v51, %v304_v47  ;;  %v509_v47 = vld [vmem:[%s2314_s3 + $0x1e8] sm:$0xff]  ;;  %v1539_v50 = vpack.c.bf16 %v476_v41, %v460_v40  ;;  %v1547_v51 = vpack.c.bf16 %v478_v45, %v462_v44  ;;  %v492_v52 = vld [vmem:[%s2314_s3 + $0x160] sm:$0xff] }
 0x11c   :  { %v1549_v54 = vpack.c.bf16 %v511_v49, %v495_v48  ;;  %v1543_v58 = vpack.c.bf16 %v508_v55, %v492_v52 }
 0x11d   :  { %v444_v63 = vadd.f32 %v1360_v53, %v374_v56  ;;  %v1541_v53 = vpack.c.bf16 %v509_v47, %v493_v46  ;;  %v494_v56 = vld [vmem:[%s2314_s3 + $0x170] sm:$0xff] }
 0x11e   :  { %v1551_v59 = vpack.c.bf16 %v510_v57, %v494_v56 }
 0x11f   :  { %v2145_v4 = vmax.f32 %v444_v63, 0.0  ;;  %v526_v63 = vsub.s32 2, %v2271_v61 }
 0x121   :  { %1213 = vmatmul.mubr.msk.f32.vlgmr.msra.gmra.mrb[4].mxu0 %vm596_vm0, %v2145_v4  ;;  %1214 = vmatmul.mubr.msk.f32.vlgmr.msra.gmra.mrb[4].mxu1 %vm596_vm0, %v2145_v4 }
 0x122   :  { %1508 = vmatpush1.bf16.msra.mxu0 %v1507_v0  ;;  %1516 = vmatpush1.bf16.msra.mxu1 %v1515_v1  ;;  %v512_v0 = vld [vmem:[%s2315_s4] sm:$0xff]  ;;  %v530_v1 = vsub.s32 3, %v2271_v61 }
 0x123   :  { %1510 = vmatprep.subr.bf16.mxu0 %v1509_v5  ;;  %1518 = vmatprep.subr.bf16.mxu1 %v1517_v6  ;;  %v519_v2 = vrot.slane %v512_v0, %v518_v62  ;;  %v527_v3 = vrot.slane %v512_v0, %v526_v63  ;;  %v539_v20 = vrot.slane %v512_v0, %v538_v16 }
 0x124   :  { %806 = vmatprep.mubr.f32.mxu0 %v1604_v38  ;;  %877 = vmatprep.mubr.f32.mxu1 %v1604_v38  ;;  %v531_v6 = vrot.slane %v512_v0, %v530_v1 }
 0x126   :  { %1512 = vmatpush1.bf16.msra.mxu0 %v1511_v13  ;;  %1520 = vmatpush1.bf16.msra.mxu1 %v1519_v14  ;;  %v542_v13 = vsub.s32 6, %v2271_v61 }
 0x127   :  { %1522 = vmatprep.subr.bf16.mxu0 %v1521_v17  ;;  %1530 = vmatprep.subr.bf16.mxu1 %v1529_v18  ;;  %v546_v17 = vsub.s32 7, %v2271_v61  ;;  %v535_v18 = vrot.slane %v512_v0, %v534_v12 }
 0x128   :  { %v543_v19 = vrot.slane %v512_v0, %v542_v13 }
 0x129   :  { %1215 = vmatmul.mubr.msk.f32.vlgmr.msra.gmra.mrb[6].mxu0 %vm596_vm0, %v2145_v4  ;;  %1216 = vmatmul.mubr.msk.f32.vlgmr.msra.gmra.mrb[6].mxu1 %vm596_vm0, %v2145_v4  ;;  %v547_v21 = vrot.slane %v512_v0, %v546_v17 }
 0x12a   :  { %1524 = vmatpush1.bf16.msra.mxu0 %v1523_v25  ;;  %1532 = vmatpush1.bf16.msra.mxu1 %v1531_v26 }
 0x12b   :  { %1526 = vmatprep.subr.bf16.mxu0 %v1525_v29  ;;  %1534 = vmatprep.subr.bf16.mxu1 %v1533_v30  ;;  %v513_v30 = vld [vmem:[%s2315_s4 + $0x8] sm:$0xff] }
 0x12c   :  { %948 = vmatprep.mubr.f32.mxu0 %v1604_v38  ;;  %1019 = vmatprep.mubr.f32.mxu1 %v1604_v38  ;;  %v551_v31 = vrot.slane %v513_v30, %v518_v62  ;;  %v559_v32 = vrot.slane %v513_v30, %v526_v63 }
 0x12e   :  { %1528 = vmatpush1.bf16.msra.mxu0 %v1527_v37  ;;  %1536 = vmatpush1.bf16.msra.mxu1 %v1535_v39 }
 0x12f   :  { %1538 = vmatprep.subr.bf16.mxu0 %v1537_v42  ;;  %1546 = vmatprep.subr.bf16.mxu1 %v1545_v43 }
 0x131   :  { %1217 = vmatmul.mubr.msk.f32.vlgmr.msra.gmra.mrb[8].mxu0 %vm596_vm0, %v2145_v4  ;;  %1218 = vmatmul.mubr.msk.f32.vlgmr.msra.gmra.mrb[8].mxu1 %vm596_vm0, %v2145_v4 }
 0x132   :  { %1540 = vmatpush1.bf16.msra.mxu0 %v1539_v50  ;;  %1548 = vmatpush1.bf16.msra.mxu1 %v1547_v51 }
 0x133   :  { %1542 = vmatprep.subr.bf16.mxu0 %v1541_v53  ;;  %1550 = vmatprep.subr.bf16.mxu1 %v1549_v54 }
 0x134   :  { %1090 = vmatprep.mubr.f32.mxu0 %v1604_v38  ;;  %1161 = vmatprep.mubr.f32.mxu1 %v1604_v38  ;;  %v522_v38 = vsub.s32 1, %v2271_v61 }
 0x136   :  { %1544 = vmatpush1.bf16.msra.mxu0 %v1543_v58  ;;  %1552 = vmatpush1.bf16.msra.mxu1 %v1551_v59  ;;  %v523_v5 = vrot.slane %v512_v0, %v522_v38 }
 0x139   :  { %1219 = vmatmul.mubr.msk.f32.vlgmr.msra.gmra.mrb[10].mxu0 %vm596_vm0, %v2145_v4  ;;  %1220 = vmatmul.mubr.msk.f32.vlgmr.msra.gmra.mrb[10].mxu1 %vm596_vm0, %v2145_v4 }
 0x1f4   :  { %v666_v4 = vpop.f32.mrb[4].mxu0  ;;  %v737_v7 = vpop.f32.mrb[4].mxu1 }
 0x1f5   :  { %v667_v8 = vadd.f32 %v666_v4, %v519_v2  ;;  %v738_v9 = vadd.f32 %v737_v7, %v527_v3  ;;  %v668_v10 = vpop.f32.mrb[5].mxu0  ;;  %v739_v11 = vpop.f32.mrb[5].mxu1 }
 0x1f6   :  { %v669_v14 = vadd.f32 %v668_v10, %v523_v5  ;;  %v740_v15 = vadd.f32 %v739_v11, %v531_v6 }
 0x1f7   :  { %1168 = vst [vmem:[#allocation2] sm:$0xff] %v667_v8  ;;  %1170 = vst [vmem:[#allocation2 + $0x10] sm:$0xff] %v738_v9 }
 0x1f8   :  { %1169 = vst [vmem:[#allocation2 + $0x8] sm:$0xff] %v669_v14  ;;  %1171 = vst [vmem:[#allocation2 + $0x18] sm:$0xff] %v740_v15 }
 0x1fc   :  { %v808_v22 = vpop.f32.mrb[6].mxu0  ;;  %v879_v23 = vpop.f32.mrb[6].mxu1 }
 0x1fd   :  { %v809_v24 = vadd.f32 %v808_v22, %v535_v18  ;;  %v880_v25 = vadd.f32 %v879_v23, %v543_v19  ;;  %v810_v26 = vpop.f32.mrb[7].mxu0  ;;  %v881_v27 = vpop.f32.mrb[7].mxu1 }
 0x1fe   :  { %v811_v28 = vadd.f32 %v810_v26, %v539_v20  ;;  %v882_v29 = vadd.f32 %v881_v27, %v547_v21 }
 0x1ff   :  { %1172 = vst [vmem:[#allocation2 + $0x20] sm:$0xff] %v809_v24  ;;  %1174 = vst [vmem:[#allocation2 + $0x30] sm:$0xff] %v880_v25 }
 0x200   :  { %1173 = vst [vmem:[#allocation2 + $0x28] sm:$0xff] %v811_v28  ;;  %1175 = vst [vmem:[#allocation2 + $0x38] sm:$0xff] %v882_v29 }
 0x201   :  { %1567 = shalt.err (!%p1564_p4)
}
 0x202   :  { %s1568_s8 = scalar_lea.hbm %s2316_s5, 1024 }
 0x203   :  { %p1569_p5 = scmp.ne.s32.totalorder %s2316_s5, %s1568_s8  ;;  %p1572_p6 = scmp.lt.u32.totalorder %s1568_s8, %s2316_s5 }
 0x205   :  { %p1574_p7 = pnand %p1572_p6, %p1569_p5 }
 0x207   :  { %1577 = shalt.err (!%p1574_p7)
}
 0x208   :  { %1193 = dma.vmem_to_hbm [thread:$0]  %s1191_s27, 1024, %s2316_s5, [#allocation3]   ;;  %v555_v33 = vrot.slane %v513_v30, %v522_v38  ;;  %v563_v34 = vrot.slane %v513_v30, %v530_v1  ;;  %v950_v35 = vpop.f32.mrb[8].mxu0  ;;  %v1021_v36 = vpop.f32.mrb[8].mxu1  ;;  %v567_v44 = vrot.slane %v513_v30, %v534_v12  ;;  %v575_v45 = vrot.slane %v513_v30, %v542_v13 }
 0x209   :  { %v951_v37 = vadd.f32 %v950_v35, %v551_v31  ;;  %v1022_v39 = vadd.f32 %v1021_v36, %v559_v32  ;;  %v952_v40 = vpop.f32.mrb[9].mxu0  ;;  %v1023_v41 = vpop.f32.mrb[9].mxu1  ;;  %v571_v46 = vrot.slane %v513_v30, %v538_v16  ;;  %v579_v47 = vrot.slane %v513_v30, %v546_v17  ;;  %s1606_s13 = smov [#allocation4]  }
 0x20a   :  { %v953_v42 = vadd.f32 %v952_v40, %v555_v33  ;;  %v1024_v43 = vadd.f32 %v1023_v41, %v563_v34  ;;  %s1200_s5 = sshll.u32 %s1606_s13, 4  ;;  %s1201_s5 = int_to_ptr.vmem [resolvable:$true] %s1200_s5 }
 0x20b   :  { %1176 = vst [vmem:[#allocation4] sm:$0xff] %v951_v37  ;;  %1178 = vst [vmem:[#allocation4 + $0x10] sm:$0xff] %v1022_v39  ;;  %s1578_s14 = scalar_lea.vmem %s1201_s5, 1024  ;;  %p1583_p9 = scmp.lt.s32.totalorder %s1201_s5, %s1201_s5 }
 0x20c   :  { %1177 = vst [vmem:[#allocation4 + $0x8] sm:$0xff] %v953_v42  ;;  %1179 = vst [vmem:[#allocation4 + $0x18] sm:$0xff] %v1024_v43  ;;  %v1092_v48 = vpop.f32.mrb[10].mxu0  ;;  %v1163_v49 = vpop.f32.mrb[10].mxu1  ;;  %p1579_p8 = scmp.ne.s32.totalorder %s1201_s5, %s1578_s14  ;;  %p1584_p10 = scmp.lt.s32.totalorder %s1578_s14, %s1578_s14 }
 0x20d   :  { %v1093_v50 = vadd.f32 %v1092_v48, %v567_v44  ;;  %v1164_v51 = vadd.f32 %v1163_v49, %v575_v45  ;;  %v1094_v52 = vpop.f32.mrb[11].mxu0  ;;  %v1165_v53 = vpop.f32.mrb[11].mxu1 }
 0x20e   :  { %v1095_v54 = vadd.f32 %v1094_v52, %v571_v46  ;;  %v1166_v55 = vadd.f32 %v1165_v53, %v579_v47  ;;  %p1585_p11 = por %p1584_p10, %p1583_p9 }
 0x20f   :  { %1180 = vst [vmem:[#allocation4 + $0x20] sm:$0xff] %v1093_v50  ;;  %1182 = vst [vmem:[#allocation4 + $0x30] sm:$0xff] %v1164_v51 }
 0x210   :  { %1181 = vst [vmem:[#allocation4 + $0x28] sm:$0xff] %v1095_v54  ;;  %1183 = vst [vmem:[#allocation4 + $0x38] sm:$0xff] %v1166_v55  ;;  %p1586_p12 = pnand %p1585_p11, %p1579_p8 }
 0x212   :  { %1589 = shalt.err (!%p1586_p12)
}
 0x213   :  { %s1590_s17 = scalar_lea.hbm %s2317_s6, 1024 }
 0x214   :  { %p1591_p13 = scmp.ne.s32.totalorder %s2317_s6, %s1590_s17  ;;  %p1594_p0 = scmp.lt.u32.totalorder %s1590_s17, %s2317_s6 }
 0x216   :  { %p1596_p1 = pnand %p1594_p0, %p1591_p13 }
 0x218   :  { %1599 = shalt.err (!%p1596_p1)
}
 0x219   :  { %1203 = dma.vmem_to_hbm [thread:$0]  %s1201_s5, 1024, %s2317_s6, [#allocation5]  }
 0x21a   :  { %1600 = dma.done.wait [#allocation3], 1024  }
 0x21b   :  { %1601 = vsyncadd [#allocation3], 4294966272 }
 0x21c   :  { %1602 = dma.done.wait [#allocation5], 1024  }
 0x21d   :  { %1603 = vsyncadd [#allocation5], 4294966272 }
 0x21e   :  { %1210 = vsyncpa [#allocation3], 1 }
 0x21f   :  { %1211 = vsyncpa [#allocation5], 1 }

</bundles_post_ra>
